<compile_context>
chip_gen: v5e
topology: v5e:2x2
jax: 0.10.0
libtpu: 0.0.40
codegen_flags: <defaults>
</compile_context>

<pallas_src>
import jax
import jax.numpy as jnp
from jax.experimental import pallas as pl
from jax.experimental.pallas import tpu as pltpu

VISIBLE = 784
HIDDEN = 128


def rbm_kernel(v_ref, w_ref, wt_ref, vb_ref, hb_ref, rh_ref, rv_ref,
               ph_ref, h1_ref, pv_ref, v2_ref):
    v = v_ref[...]                                   # (TB, 784)

    # --- visible -> hidden -------------------------------------------------
    pre_h = jnp.dot(v, w_ref[...],                   # (TB, 128), MXU f32 acc
                    preferred_element_type=jnp.float32) + hb_ref[...]
    p_h = jax.nn.sigmoid(pre_h)
    # relu(sign(p - rand)): 1.0 where p > rand else 0.0 (sign(0)=0 -> relu -> 0)
    h1 = jnp.where(p_h - rh_ref[...] > 0.0, 1.0, 0.0).astype(jnp.float32)

    # --- hidden -> visible ---------------------------------------------------
    # Pre-transposed W (W_T = W.T, done once in the wrapper) -> plain matmul,
    # no in-kernel transpose.
    pre_v = jnp.dot(h1, wt_ref[...],                 # (TB, 784)
                    preferred_element_type=jnp.float32) + vb_ref[...]
    p_v = jax.nn.sigmoid(pre_v)
    v2 = jnp.where(p_v - rv_ref[...] > 0.0, 1.0, 0.0).astype(jnp.float32)

    ph_ref[...] = p_h
    h1_ref[...] = h1
    pv_ref[...] = p_v
    v2_ref[...] = v2


def _round_up(x, m):
    return ((x + m - 1) // m) * m


def rbm_forward(v, W, v_bias, h_bias, rand_h, rand_v, *, block_b=512):
    B = v.shape[0]

    # Batch tile: multiple of 8 sublanes, capped at block_b (sized so the
    # double-buffered working set fits v7x's smaller scoped VMEM).
    TB = min(block_b, _round_up(B, 8))
    Bp = _round_up(B, TB)
    if Bp != B:
        pad = Bp - B
        v = jnp.pad(v, ((0, pad), (0, 0)))
        rand_h = jnp.pad(rand_h, ((0, pad), (0, 0)))
        rand_v = jnp.pad(rand_v, ((0, pad), (0, 0)))

    W_T = W.T                                  # one-time transpose on the host side
    vb2 = v_bias.reshape(1, VISIBLE)
    hb2 = h_bias.reshape(1, HIDDEN)

    grid = (Bp // TB,)

    batch_map = lambda i: (i, 0)               # batch-tiled operands
    const_map = lambda i: (0, 0)               # resident operands (W, W_T, biases)

    out_shapes = (
        jax.ShapeDtypeStruct((Bp, HIDDEN), jnp.float32),   # p_h1
        jax.ShapeDtypeStruct((Bp, HIDDEN), jnp.float32),   # h1
        jax.ShapeDtypeStruct((Bp, VISIBLE), jnp.float32),  # p_v2
        jax.ShapeDtypeStruct((Bp, VISIBLE), jnp.float32),  # v2
    )

    p_h1, h1, p_v2, v2 = pl.pallas_call(
        rbm_kernel,
        out_shape=out_shapes,
        grid=grid,
        in_specs=[
            pl.BlockSpec((TB, VISIBLE), batch_map),        # v
            pl.BlockSpec((VISIBLE, HIDDEN), const_map),    # W
            pl.BlockSpec((HIDDEN, VISIBLE), const_map),    # W_T
            pl.BlockSpec((1, VISIBLE), const_map),         # v_bias
            pl.BlockSpec((1, HIDDEN), const_map),          # h_bias
            pl.BlockSpec((TB, HIDDEN), batch_map),         # rand_h
            pl.BlockSpec((TB, VISIBLE), batch_map),        # rand_v
        ],
        out_specs=[
            pl.BlockSpec((TB, HIDDEN), batch_map),         # p_h1
            pl.BlockSpec((TB, HIDDEN), batch_map),         # h1
            pl.BlockSpec((TB, VISIBLE), batch_map),        # p_v2
            pl.BlockSpec((TB, VISIBLE), batch_map),        # v2
        ],
        compiler_params=pltpu.CompilerParams(
            dimension_semantics=("parallel",),             # megacore on v7x
            vmem_limit_bytes=48 << 20,
        ),
    )(v, W, W_T, vb2, hb2, rand_h, rand_v)

    if Bp != B:
        p_h1, h1, p_v2, v2 = p_h1[:B], h1[:B], p_v2[:B], v2[:B]
    return p_h1, h1, p_v2, v2


if __name__ == "__main__":
    key = jax.random.PRNGKey(0)
    k_w, k_v, k_rh, k_rv = jax.random.split(key, 4)

    B = 2
    # Deterministic parameter init matching torch.randn(784,128)*0.01 / zeros.
    W = jax.random.normal(k_w, (VISIBLE, HIDDEN), dtype=jnp.float32) * 0.01
    v_bias = jnp.zeros((VISIBLE,), dtype=jnp.float32)
    h_bias = jnp.zeros((HIDDEN,), dtype=jnp.float32)

    # Example visible input in [0,1) (MNIST-like probabilities).
    v = jax.random.uniform(k_v, (B, VISIBLE), dtype=jnp.float32)

    # Uniform randoms used by sample_from_p (torch.rand equivalents).
    rand_h = jax.random.uniform(k_rh, (B, HIDDEN), dtype=jnp.float32)
    rand_v = jax.random.uniform(k_rv, (B, VISIBLE), dtype=jnp.float32)

    p_h1, h1, p_v2, v2 = rbm_forward(v, W, v_bias, h_bias, rand_h, rand_v)
    jax.block_until_ready((p_h1, h1, p_v2, v2))

    # Reference check in plain JAX.
    ref_ph = jax.nn.sigmoid(v @ W + h_bias)
    ref_h1 = jnp.where(ref_ph - rand_h > 0.0, 1.0, 0.0)
    ref_pv = jax.nn.sigmoid(ref_h1 @ W.T + v_bias)
    ref_v2 = jnp.where(ref_pv - rand_v > 0.0, 1.0, 0.0)

    assert jnp.allclose(p_h1, ref_ph, atol=1e-5), "p_h1 mismatch"
    assert jnp.array_equal(h1, ref_h1), "h1 mismatch"
    assert jnp.allclose(p_v2, ref_pv, atol=1e-5), "p_v2 mismatch"
    assert jnp.array_equal(v2, ref_v2), "v2 mismatch"

    print("KERNEL_OK")
</pallas_src>

<mosaic_0001>
module attributes {stable_mosaic.version = 11 : i64} {
  func.func @rbm_kernel(%arg0: i32, %arg1: memref<8x784xf32, #tpu.memory_space<vmem>>, %arg2: memref<784x128xf32, #tpu.memory_space<vmem>>, %arg3: memref<128x784xf32, #tpu.memory_space<vmem>>, %arg4: memref<1x784xf32, #tpu.memory_space<vmem>>, %arg5: memref<1x128xf32, #tpu.memory_space<vmem>>, %arg6: memref<8x128xf32, #tpu.memory_space<vmem>>, %arg7: memref<8x784xf32, #tpu.memory_space<vmem>>, %arg8: memref<8x128xf32, #tpu.memory_space<vmem>>, %arg9: memref<8x128xf32, #tpu.memory_space<vmem>>, %arg10: memref<8x784xf32, #tpu.memory_space<vmem>>, %arg11: memref<8x784xf32, #tpu.memory_space<vmem>>) attributes {dimension_semantics = [#tpu.dimension_semantics<parallel>], iteration_bounds = array<i64: 1>, scalar_prefetch = 0 : i64, scratch_operands = 0 : i64, tpu.core_type = #tpu.core_type<tc>, window_params = [{transform_indices = @transform_0, window_bounds = array<i64: 8, 784>}, {pipeline_mode = #tpu.pipeline_mode<synchronous>, transform_indices = @transform_1, window_bounds = array<i64: 784, 128>}, {pipeline_mode = #tpu.pipeline_mode<synchronous>, transform_indices = @transform_2, window_bounds = array<i64: 128, 784>}, {pipeline_mode = #tpu.pipeline_mode<synchronous>, transform_indices = @transform_3, window_bounds = array<i64: 1, 784>}, {pipeline_mode = #tpu.pipeline_mode<synchronous>, transform_indices = @transform_4, window_bounds = array<i64: 1, 128>}, {transform_indices = @transform_5, window_bounds = array<i64: 8, 128>}, {transform_indices = @transform_6, window_bounds = array<i64: 8, 784>}, {transform_indices = @transform_7, window_bounds = array<i64: 8, 128>}, {transform_indices = @transform_8, window_bounds = array<i64: 8, 128>}, {transform_indices = @transform_9, window_bounds = array<i64: 8, 784>}, {transform_indices = @transform_10, window_bounds = array<i64: 8, 784>}]} {
    %c0 = arith.constant 0 : index
    %c0_0 = arith.constant 0 : index
    %0 = vector.load %arg1[%c0, %c0_0] : memref<8x784xf32, #tpu.memory_space<vmem>>, vector<8x784xf32>
    %c0_1 = arith.constant 0 : index
    %c0_2 = arith.constant 0 : index
    %1 = vector.load %arg2[%c0_1, %c0_2] : memref<784x128xf32, #tpu.memory_space<vmem>>, vector<784x128xf32>
    %cst = arith.constant dense<0.000000e+00> : vector<8x128xf32>
    %2 = tpu.matmul %0, %1, %cst {dimension_numbers = #tpu.dot_dimension_numbers<[1], [0], [0], [1], [0, 0, 1, 1], [], []>} : vector<8x784xf32>, vector<784x128xf32>, vector<8x128xf32> -> vector<8x128xf32>
    %c0_3 = arith.constant 0 : index
    %c0_4 = arith.constant 0 : index
    %3 = vector.load %arg5[%c0_3, %c0_4] : memref<1x128xf32, #tpu.memory_space<vmem>>, vector<1x128xf32>
    %4 = vector.broadcast %3 : vector<1x128xf32> to vector<8x128xf32>
    %5 = arith.addf %2, %4 : vector<8x128xf32>
    %6 = arith.negf %5 : vector<8x128xf32>
    %7 = math.exp %6 : vector<8x128xf32>
    %cst_5 = arith.constant 1.000000e+00 : f32
    %8 = vector.broadcast %cst_5 : f32 to vector<8x128xf32>
    %9 = arith.addf %8, %7 : vector<8x128xf32>
    %10 = arith.divf %8, %9 : vector<8x128xf32>
    %c0_6 = arith.constant 0 : index
    %c0_7 = arith.constant 0 : index
    %11 = vector.load %arg6[%c0_6, %c0_7] : memref<8x128xf32, #tpu.memory_space<vmem>>, vector<8x128xf32>
    %12 = arith.subf %10, %11 : vector<8x128xf32>
    %cst_8 = arith.constant 0.000000e+00 : f32
    %13 = vector.broadcast %cst_8 : f32 to vector<8x128xf32>
    %14 = arith.cmpf ogt, %12, %13 : vector<8x128xf32>
    %cst_9 = arith.constant 1.000000e+00 : f32
    %cst_10 = arith.constant 0.000000e+00 : f32
    %15 = vector.broadcast %cst_9 : f32 to vector<8x128xf32>
    %16 = vector.broadcast %cst_10 : f32 to vector<8x128xf32>
    %17 = arith.select %14, %15, %16 : vector<8x128xi1>, vector<8x128xf32>
    %c0_11 = arith.constant 0 : index
    %c0_12 = arith.constant 0 : index
    %18 = vector.load %arg3[%c0_11, %c0_12] : memref<128x784xf32, #tpu.memory_space<vmem>>, vector<128x784xf32>
    %cst_13 = arith.constant dense<0.000000e+00> : vector<8x784xf32>
    %19 = tpu.matmul %17, %18, %cst_13 {dimension_numbers = #tpu.dot_dimension_numbers<[1], [0], [0], [1], [0, 0, 1, 1], [], []>} : vector<8x128xf32>, vector<128x784xf32>, vector<8x784xf32> -> vector<8x784xf32>
    %c0_14 = arith.constant 0 : index
    %c0_15 = arith.constant 0 : index
    %20 = vector.load %arg4[%c0_14, %c0_15] : memref<1x784xf32, #tpu.memory_space<vmem>>, vector<1x784xf32>
    %21 = vector.broadcast %20 : vector<1x784xf32> to vector<8x784xf32>
    %22 = arith.addf %19, %21 : vector<8x784xf32>
    %23 = arith.negf %22 : vector<8x784xf32>
    %24 = math.exp %23 : vector<8x784xf32>
    %cst_16 = arith.constant 1.000000e+00 : f32
    %25 = vector.broadcast %cst_16 : f32 to vector<8x784xf32>
    %26 = arith.addf %25, %24 : vector<8x784xf32>
    %27 = arith.divf %25, %26 : vector<8x784xf32>
    %c0_17 = arith.constant 0 : index
    %c0_18 = arith.constant 0 : index
    %28 = vector.load %arg7[%c0_17, %c0_18] : memref<8x784xf32, #tpu.memory_space<vmem>>, vector<8x784xf32>
    %29 = arith.subf %27, %28 : vector<8x784xf32>
    %cst_19 = arith.constant 0.000000e+00 : f32
    %30 = vector.broadcast %cst_19 : f32 to vector<8x784xf32>
    %31 = arith.cmpf ogt, %29, %30 : vector<8x784xf32>
    %cst_20 = arith.constant 1.000000e+00 : f32
    %cst_21 = arith.constant 0.000000e+00 : f32
    %32 = vector.broadcast %cst_20 : f32 to vector<8x784xf32>
    %33 = vector.broadcast %cst_21 : f32 to vector<8x784xf32>
    %34 = arith.select %31, %32, %33 : vector<8x784xi1>, vector<8x784xf32>
    %c0_22 = arith.constant 0 : index
    %c0_23 = arith.constant 0 : index
    %35 = vector.load %arg8[%c0_22, %c0_23] : memref<8x128xf32, #tpu.memory_space<vmem>>, vector<8x128xf32>
    tpu.vector_store %arg8[%c0_22, %c0_23], %10 {strides = array<i32>} : memref<8x128xf32, #tpu.memory_space<vmem>>, vector<8x128xf32>,
    %c0_24 = arith.constant 0 : index
    %c0_25 = arith.constant 0 : index
    %36 = vector.load %arg9[%c0_24, %c0_25] : memref<8x128xf32, #tpu.memory_space<vmem>>, vector<8x128xf32>
    tpu.vector_store %arg9[%c0_24, %c0_25], %17 {strides = array<i32>} : memref<8x128xf32, #tpu.memory_space<vmem>>, vector<8x128xf32>,
    %c0_26 = arith.constant 0 : index
    %c0_27 = arith.constant 0 : index
    %37 = vector.load %arg10[%c0_26, %c0_27] : memref<8x784xf32, #tpu.memory_space<vmem>>, vector<8x784xf32>
    tpu.vector_store %arg10[%c0_26, %c0_27], %27 {strides = array<i32>} : memref<8x784xf32, #tpu.memory_space<vmem>>, vector<8x784xf32>,
    %c0_28 = arith.constant 0 : index
    %c0_29 = arith.constant 0 : index
    %38 = vector.load %arg11[%c0_28, %c0_29] : memref<8x784xf32, #tpu.memory_space<vmem>>, vector<8x784xf32>
    tpu.vector_store %arg11[%c0_28, %c0_29], %34 {strides = array<i32>} : memref<8x784xf32, #tpu.memory_space<vmem>>, vector<8x784xf32>,
    return
  }
  func.func @transform_0(%arg0: i32) -> (i32, i32) {
    %c0_i32 = arith.constant 0 : i32
    %c0_i32_0 = arith.constant 0 : i32
    return %arg0, %c0_i32 : i32, i32
  }
  func.func @transform_1(%arg0: i32) -> (i32, i32) {
    %c0_i32 = arith.constant 0 : i32
    %c0_i32_0 = arith.constant 0 : i32
    %c0_i32_1 = arith.constant 0 : i32
    return %c0_i32, %c0_i32_0 : i32, i32
  }
  func.func @transform_2(%arg0: i32) -> (i32, i32) {
    %c0_i32 = arith.constant 0 : i32
    %c0_i32_0 = arith.constant 0 : i32
    %c0_i32_1 = arith.constant 0 : i32
    return %c0_i32, %c0_i32_0 : i32, i32
  }
  func.func @transform_3(%arg0: i32) -> (i32, i32) {
    %c0_i32 = arith.constant 0 : i32
    %c0_i32_0 = arith.constant 0 : i32
    %c0_i32_1 = arith.constant 0 : i32
    return %c0_i32, %c0_i32_0 : i32, i32
  }
  func.func @transform_4(%arg0: i32) -> (i32, i32) {
    %c0_i32 = arith.constant 0 : i32
    %c0_i32_0 = arith.constant 0 : i32
    %c0_i32_1 = arith.constant 0 : i32
    return %c0_i32, %c0_i32_0 : i32, i32
  }
  func.func @transform_5(%arg0: i32) -> (i32, i32) {
    %c0_i32 = arith.constant 0 : i32
    %c0_i32_0 = arith.constant 0 : i32
    return %arg0, %c0_i32 : i32, i32
  }
  func.func @transform_6(%arg0: i32) -> (i32, i32) {
    %c0_i32 = arith.constant 0 : i32
    %c0_i32_0 = arith.constant 0 : i32
    return %arg0, %c0_i32 : i32, i32
  }
  func.func @transform_7(%arg0: i32) -> (i32, i32) {
    %c0_i32 = arith.constant 0 : i32
    %c0_i32_0 = arith.constant 0 : i32
    return %arg0, %c0_i32 : i32, i32
  }
  func.func @transform_8(%arg0: i32) -> (i32, i32) {
    %c0_i32 = arith.constant 0 : i32
    %c0_i32_0 = arith.constant 0 : i32
    return %arg0, %c0_i32 : i32, i32
  }
  func.func @transform_9(%arg0: i32) -> (i32, i32) {
    %c0_i32 = arith.constant 0 : i32
    %c0_i32_0 = arith.constant 0 : i32
    return %arg0, %c0_i32 : i32, i32
  }
  func.func @transform_10(%arg0: i32) -> (i32, i32) {
    %c0_i32 = arith.constant 0 : i32
    %c0_i32_0 = arith.constant 0 : i32
    return %arg0, %c0_i32 : i32, i32
  }
}

</mosaic_0001>

<bundles_post_ra>
// kernel: tpu_custom_call.1
= control target key start
LH: loop header
LB: loop body
LE: loop exit
PB: predicated region body
PF: predicated region fallthrough
CT: control target
= control target key end

     0   :  { %16 = vsyncpa [#allocation3], 0  ;;  %s1814_s0 = inlined_call_operand.vmem [shape: f32[8,784], index: 0, kind: input, shape index: {}]   ;;  %s1815_s1 = inlined_call_operand.vmem [shape: f32[784,128], index: 1, kind: input, shape index: {}]   ;;  %s1816_s2 = inlined_call_operand.vmem [shape: f32[128,784], index: 2, kind: input, shape index: {}]   ;;  %s1817_s3 = inlined_call_operand.vmem [shape: f32[1,784], index: 3, kind: input, shape index: {}]   ;;  %s1818_s4 = inlined_call_operand.vmem [shape: f32[1,128], index: 4, kind: input, shape index: {}]   ;;  %s1819_s5 = inlined_call_operand.vmem [shape: f32[8,128], index: 5, kind: input, shape index: {}]   ;;  %s1820_s6 = inlined_call_operand.vmem [shape: f32[8,784], index: 6, kind: input, shape index: {}]   ;;  %s1821_s7 = inlined_call_operand.hbm [shape: f32[8,128], index: 7, kind: output, shape index: {0}]   ;;  %s1822_s8 = inlined_call_operand.hbm [shape: f32[8,128], index: 8, kind: output, shape index: {1}]   ;;  %s1823_s9 = inlined_call_operand.hbm [shape: f32[8,784], index: 9, kind: output, shape index: {2}]   ;;  %s1824_s10 = inlined_call_operand.hbm [shape: f32[8,784], index: 10, kind: output, shape index: {3}]  }
   0x1   :  { %17 = vsyncpa [#allocation5], 0  ;;  %v55_v0 = vld [vmem:[%s1815_s1 + $0x78] sm:$0xff]  ;;  %v54_v1 = vld [vmem:[%s1815_s1 + $0x70] sm:$0xff] }
   0x2   :  { %v71_v2 = vld [vmem:[%s1815_s1 + $0xf8] sm:$0xff]  ;;  %146 = vmatpush.msra.mxu0 %v55_v0  ;;  %v70_v3 = vld [vmem:[%s1815_s1 + $0xf0] sm:$0xff]  ;;  %v53_v4 = vld [vmem:[%s1815_s1 + $0x68] sm:$0xff] }
   0x3   :  { %166 = vmatpush.msra.mxu1 %v71_v2  ;;  %v69_v5 = vld [vmem:[%s1815_s1 + $0xe8] sm:$0xff]  ;;  %v52_v6 = vld [vmem:[%s1815_s1 + $0x60] sm:$0xff]  ;;  %v51_v8 = vld [vmem:[%s1815_s1 + $0x58] sm:$0xff] }
   0x4   :  { %147 = vmatpush.msra.mxu0 %v54_v1  ;;  %v68_v7 = vld [vmem:[%s1815_s1 + $0xe0] sm:$0xff]  ;;  %v67_v9 = vld [vmem:[%s1815_s1 + $0xd8] sm:$0xff]  ;;  %v50_v10 = vld [vmem:[%s1815_s1 + $0x50] sm:$0xff] }
   0x5   :  { %167 = vmatpush.msra.mxu1 %v70_v3  ;;  %v87_v11 = vld [vmem:[%s1815_s1 + $0x178] sm:$0xff]  ;;  %v66_v12 = vld [vmem:[%s1815_s1 + $0xd0] sm:$0xff]  ;;  %v85_v15 = vld [vmem:[%s1815_s1 + $0x168] sm:$0xff] }
   0x6   :  { %148 = vmatpush.msra.mxu0 %v53_v4  ;;  %186 = vmatpush.msra.mxu2 %v87_v11  ;;  %v86_v13 = vld [vmem:[%s1815_s1 + $0x170] sm:$0xff]  ;;  %v103_v14 = vld [vmem:[%s1815_s1 + $0x1f8] sm:$0xff]  ;;  %v49_v17 = vld [vmem:[%s1815_s1 + $0x48] sm:$0xff] }
   0x7   :  { %168 = vmatpush.msra.mxu1 %v69_v5  ;;  %v102_v16 = vld [vmem:[%s1815_s1 + $0x1f0] sm:$0xff]  ;;  %v65_v18 = vld [vmem:[%s1815_s1 + $0xc8] sm:$0xff]  ;;  %206 = vmatpush.msra.mxu3 %v103_v14  ;;  %v84_v19 = vld [vmem:[%s1815_s1 + $0x160] sm:$0xff] }
   0x8   :  { %149 = vmatpush.msra.mxu0 %v52_v6  ;;  %187 = vmatpush.msra.mxu2 %v86_v13  ;;  %v101_v20 = vld [vmem:[%s1815_s1 + $0x1e8] sm:$0xff]  ;;  %v48_v21 = vld [vmem:[%s1815_s1 + $0x40] sm:$0xff]  ;;  %v83_v23 = vld [vmem:[%s1815_s1 + $0x158] sm:$0xff] }
   0x9   :  { %169 = vmatpush.msra.mxu1 %v68_v7  ;;  %v64_v22 = vld [vmem:[%s1815_s1 + $0xc0] sm:$0xff]  ;;  %207 = vmatpush.msra.mxu3 %v102_v16  ;;  %v47_v25 = vld [vmem:[%s1815_s1 + $0x38] sm:$0xff]  ;;  %v82_v27 = vld [vmem:[%s1815_s1 + $0x150] sm:$0xff] }
   0xa   :  { %150 = vmatpush.msra.mxu0 %v51_v8  ;;  %188 = vmatpush.msra.mxu2 %v85_v15  ;;  %v100_v24 = vld [vmem:[%s1815_s1 + $0x1e0] sm:$0xff]  ;;  %v63_v26 = vld [vmem:[%s1815_s1 + $0xb8] sm:$0xff]  ;;  %v46_v29 = vld [vmem:[%s1815_s1 + $0x30] sm:$0xff] }
   0xb   :  { %170 = vmatpush.msra.mxu1 %v67_v9  ;;  %208 = vmatpush.msra.mxu3 %v101_v20  ;;  %v99_v28 = vld [vmem:[%s1815_s1 + $0x1d8] sm:$0xff]  ;;  %v62_v30 = vld [vmem:[%s1815_s1 + $0xb0] sm:$0xff]  ;;  %v81_v31 = vld [vmem:[%s1815_s1 + $0x148] sm:$0xff] }
   0xc   :  { %151 = vmatpush.msra.mxu0 %v50_v10  ;;  %189 = vmatpush.msra.mxu2 %v84_v19  ;;  %v98_v32 = vld [vmem:[%s1815_s1 + $0x1d0] sm:$0xff]  ;;  %v45_v33 = vld [vmem:[%s1815_s1 + $0x28] sm:$0xff]  ;;  %v80_v35 = vld [vmem:[%s1815_s1 + $0x140] sm:$0xff] }
   0xd   :  { %171 = vmatpush.msra.mxu1 %v66_v12  ;;  %209 = vmatpush.msra.mxu3 %v100_v24  ;;  %v61_v34 = vld [vmem:[%s1815_s1 + $0xa8] sm:$0xff]  ;;  %v44_v37 = vld [vmem:[%s1815_s1 + $0x20] sm:$0xff]  ;;  %v79_v39 = vld [vmem:[%s1815_s1 + $0x138] sm:$0xff] }
   0xe   :  { %152 = vmatpush.msra.mxu0 %v49_v17  ;;  %190 = vmatpush.msra.mxu2 %v83_v23  ;;  %v97_v36 = vld [vmem:[%s1815_s1 + $0x1c8] sm:$0xff]  ;;  %v60_v38 = vld [vmem:[%s1815_s1 + $0xa0] sm:$0xff]  ;;  %v43_v41 = vld [vmem:[%s1815_s1 + $0x18] sm:$0xff] }
   0xf   :  { %172 = vmatpush.msra.mxu1 %v65_v18  ;;  %210 = vmatpush.msra.mxu3 %v99_v28  ;;  %v96_v40 = vld [vmem:[%s1815_s1 + $0x1c0] sm:$0xff]  ;;  %v59_v42 = vld [vmem:[%s1815_s1 + $0x98] sm:$0xff]  ;;  %v78_v43 = vld [vmem:[%s1815_s1 + $0x130] sm:$0xff] }
  0x10   :  { %153 = vmatpush.msra.mxu0 %v48_v21  ;;  %191 = vmatpush.msra.mxu2 %v82_v27  ;;  %v95_v44 = vld [vmem:[%s1815_s1 + $0x1b8] sm:$0xff]  ;;  %v42_v45 = vld [vmem:[%s1815_s1 + $0x10] sm:$0xff]  ;;  %v77_v47 = vld [vmem:[%s1815_s1 + $0x128] sm:$0xff] }
  0x11   :  { %173 = vmatpush.msra.mxu1 %v64_v22  ;;  %211 = vmatpush.msra.mxu3 %v98_v32  ;;  %v58_v46 = vld [vmem:[%s1815_s1 + $0x90] sm:$0xff]  ;;  %v41_v49 = vld [vmem:[%s1815_s1 + $0x8] sm:$0xff]  ;;  %v76_v51 = vld [vmem:[%s1815_s1 + $0x120] sm:$0xff] }
  0x12   :  { %154 = vmatpush.msra.mxu0 %v47_v25  ;;  %192 = vmatpush.msra.mxu2 %v81_v31  ;;  %v94_v48 = vld [vmem:[%s1815_s1 + $0x1b0] sm:$0xff]  ;;  %v57_v50 = vld [vmem:[%s1815_s1 + $0x88] sm:$0xff]  ;;  %v40_v53 = vld [vmem:[%s1815_s1] sm:$0xff] }
  0x13   :  { %174 = vmatpush.msra.mxu1 %v63_v26  ;;  %212 = vmatpush.msra.mxu3 %v97_v36  ;;  %v93_v52 = vld [vmem:[%s1815_s1 + $0x1a8] sm:$0xff]  ;;  %v56_v54 = vld [vmem:[%s1815_s1 + $0x80] sm:$0xff]  ;;  %v119_v55 = vld [vmem:[%s1815_s1 + $0x278] sm:$0xff] }
  0x14   :  { %155 = vmatpush.msra.mxu0 %v46_v29  ;;  %193 = vmatpush.msra.mxu2 %v80_v35  ;;  %v135_v56 = vld [vmem:[%s1815_s1 + $0x2f8] sm:$0xff]  ;;  %v92_v58 = vld [vmem:[%s1815_s1 + $0x1a0] sm:$0xff]  ;;  %v118_v59 = vld [vmem:[%s1815_s1 + $0x270] sm:$0xff] }
  0x15   :  { %175 = vmatpush.msra.mxu1 %v62_v30  ;;  %213 = vmatpush.msra.mxu3 %v96_v40  ;;  %v75_v57 = vld [vmem:[%s1815_s1 + $0x118] sm:$0xff]  ;;  %v134_v60 = vld [vmem:[%s1815_s1 + $0x2f0] sm:$0xff]  ;;  %v117_v63 = vld [vmem:[%s1815_s1 + $0x268] sm:$0xff] }
  0x16   :  { %156 = vmatpush.msra.mxu0 %v45_v33  ;;  %194 = vmatpush.msra.mxu2 %v79_v39  ;;  %v74_v61 = vld [vmem:[%s1815_s1 + $0x110] sm:$0xff]  ;;  %v91_v62 = vld [vmem:[%s1815_s1 + $0x198] sm:$0xff]  ;;  %v133_v0 = vld [vmem:[%s1815_s1 + $0x2e8] sm:$0xff] }
  0x17   :  { %176 = vmatpush.msra.mxu1 %v61_v34  ;;  %214 = vmatpush.msra.mxu3 %v95_v44  ;;  %v73_v1 = vld [vmem:[%s1815_s1 + $0x108] sm:$0xff]  ;;  %v90_v2 = vld [vmem:[%s1815_s1 + $0x190] sm:$0xff]  ;;  %v116_v3 = vld [vmem:[%s1815_s1 + $0x260] sm:$0xff] }
  0x18   :  { %157 = vmatpush.msra.mxu0 %v44_v37  ;;  %195 = vmatpush.msra.mxu2 %v78_v43  ;;  %v132_v4 = vld [vmem:[%s1815_s1 + $0x2e0] sm:$0xff]  ;;  %v89_v6 = vld [vmem:[%s1815_s1 + $0x188] sm:$0xff]  ;;  %v115_v7 = vld [vmem:[%s1815_s1 + $0x258] sm:$0xff] }
  0x19   :  { %177 = vmatpush.msra.mxu1 %v60_v38  ;;  %215 = vmatpush.msra.mxu3 %v94_v48  ;;  %v72_v5 = vld [vmem:[%s1815_s1 + $0x100] sm:$0xff]  ;;  %v131_v8 = vld [vmem:[%s1815_s1 + $0x2d8] sm:$0xff]  ;;  %v114_v9 = vld [vmem:[%s1815_s1 + $0x250] sm:$0xff] }
  0x1a   :  { %158 = vmatpush.msra.mxu0 %v43_v41  ;;  %196 = vmatpush.msra.mxu2 %v77_v47  ;;  %v35_v10 = vld [vmem:[%s1814_s0 + $0x10] sm:$0xff]  ;;  %v88_v11 = vld [vmem:[%s1815_s1 + $0x180] sm:$0xff] }
  0x1b   :  { %178 = vmatpush.msra.mxu1 %v59_v42  ;;  %216 = vmatpush.msra.mxu3 %v93_v52  ;;  %v130_v12 = vld [vmem:[%s1815_s1 + $0x2d0] sm:$0xff] }
  0x1c   :  { %159 = vmatpush.msra.mxu0 %v42_v45  ;;  %197 = vmatpush.msra.mxu2 %v76_v51 }
  0x1d   :  { %179 = vmatpush.msra.mxu1 %v58_v46  ;;  %217 = vmatpush.msra.mxu3 %v92_v58 }
  0x1e   :  { %160 = vmatpush.msra.mxu0 %v41_v49  ;;  %198 = vmatpush.msra.mxu2 %v75_v57 }
  0x1f   :  { %180 = vmatpush.msra.mxu1 %v57_v50  ;;  %218 = vmatpush.msra.mxu3 %v91_v62 }
  0x20   :  { %161 = vmatpush.msra.mxu0 %v40_v53  ;;  %199 = vmatpush.msra.mxu2 %v74_v61 }
  0x21   :  { %181 = vmatpush.msra.mxu1 %v56_v54  ;;  %219 = vmatpush.msra.mxu3 %v90_v2 }
  0x22   :  { %226 = vmatpush.msrb.mxu0 %v119_v55  ;;  %200 = vmatpush.msra.mxu2 %v73_v1 }
  0x23   :  { %246 = vmatpush.msrb.mxu1 %v135_v56  ;;  %220 = vmatpush.msra.mxu3 %v89_v6 }
  0x24   :  { %227 = vmatpush.msrb.mxu0 %v118_v59  ;;  %201 = vmatpush.msra.mxu2 %v72_v5 }
  0x25   :  { %247 = vmatpush.msrb.mxu1 %v134_v60 }
  0x26   :  { %228 = vmatpush.msrb.mxu0 %v117_v63 }
  0x27   :  { %248 = vmatpush.msrb.mxu1 %v133_v0 }
  0x28   :  { %229 = vmatpush.msrb.mxu0 %v116_v3 }
  0x29   :  { %249 = vmatpush.msrb.mxu1 %v132_v4 }
  0x2a   :  { %18 = vsyncpa [#allocation8], 0  ;;  %230 = vmatpush.msrb.mxu0 %v115_v7  ;;  %v137_v13 = vld [vmem:[%s1815_s1 + $0x308] sm:$0xff]  ;;  %v33_v14 = vld [vmem:[%s1814_s0] sm:$0xff]  ;;  %202 = vmatmul.f32.vlgmr.msra.gmra.mxu2 %v35_v10  ;;  %vm142_vm0 = vcmask 130048   ;;  %s772_s25 = sshll.u32 %s1822_s8, 4  ;;  %s773_s25 = int_to_ptr.hbm [resolvable:$true] %s772_s25 }
  0x2b   :  { %250 = vmatpush.msrb.mxu1 %v131_v8  ;;  %v113_v15 = vld [vmem:[%s1815_s1 + $0x248] sm:$0xff]  ;;  %221 = vmatpush.msra.mxu3 %v88_v11  ;;  %v36_v17 = vld [vmem:[%s1814_s0 + $0x18] sm:$0xff]  ;;  %v112_v19 = vld [vmem:[%s1815_s1 + $0x240] sm:$0xff]  ;;  %s976_s26 = smov [#allocation4]   ;;  %s977_s28 = smov [#allocation2]  }
  0x2c   :  { %v129_v16 = vld [vmem:[%s1815_s1 + $0x2c8] sm:$0xff]  ;;  %231 = vmatpush.msrb.mxu0 %v114_v9  ;;  %v128_v20 = vld [vmem:[%s1815_s1 + $0x2c0] sm:$0xff]  ;;  %280 = vmatpush.msrb.mxu2 %v137_v13  ;;  %v111_v23 = vld [vmem:[%s1815_s1 + $0x238] sm:$0xff]  ;;  %s770_s27 = sshll.u32 %s976_s26, 4  ;;  %s759_s29 = sshll.u32 %s977_s28, 4  ;;  %s771_s27 = int_to_ptr.vmem [resolvable:$true] %s770_s27  ;;  %s760_s29 = int_to_ptr.vmem [resolvable:$true] %s759_s29 }
  0x2d   :  { %251 = vmatpush.msrb.mxu1 %v130_v12  ;;  %v34_v18 = vld [vmem:[%s1814_s0 + $0x8] sm:$0xff]  ;;  %162 = vmatmul.f32.vlgmr.msra.gmra.mxu0 %v33_v14  ;;  %v136_v21 = vld [vmem:[%s1815_s1 + $0x300] sm:$0xff]  ;;  %v127_v24 = vld [vmem:[%s1815_s1 + $0x2b8] sm:$0xff]  ;;  %s761_s12 = sshll.u32 %s1821_s7, 4  ;;  %s978_s22 = smov [#allocation6]   ;;  %s762_s12 = int_to_ptr.hbm [resolvable:$true] %s761_s12 }
  0x2e   :  { %232 = vmatpush.msrb.mxu0 %v113_v15  ;;  %v414_v22 = vld [vmem:[%s1816_s2 + $0x348] sm:$0xff]  ;;  %222 = vmatmul.f32.vlgmr.msra.gmra.mxu3 %v36_v17  ;;  %v39_v25 = vld [vmem:[%s1814_s0 + $0x30] sm:$0xff]  ;;  %v400_v30 = vld [vmem:[%s1816_s2 + $0x2d8] sm:$0xff]  ;;  %s781_s23 = sshll.u32 %s978_s22, 4  ;;  %s782_s23 = int_to_ptr.vmem [resolvable:$true] %s781_s23 }
  0x2f   :  { %252 = vmatpush.msrb.mxu1 %v129_v16  ;;  %v407_v26 = vld [vmem:[%s1816_s2 + $0x310] sm:$0xff]  ;;  %281 = vmatpush.msrb.mxu2 %v136_v21  ;;  %v109_v31 = vld [vmem:[%s1815_s1 + $0x228] sm:$0xff]  ;;  %v408_v33 = vld [vmem:[%s1816_s2 + $0x318] sm:$0xff] }
  0x30   :  { %182 = vmatmul.f32.vlgmr.msra.gmra.mxu1 %v34_v18  ;;  %233 = vmatpush.msrb.mxu0 %v112_v19  ;;  %v110_v27 = vld [vmem:[%s1815_s1 + $0x230] sm:$0xff]  ;;  %v125_v32 = vld [vmem:[%s1815_s1 + $0x2a8] sm:$0xff]  ;;  %v393_v34 = vld [vmem:[%s1816_s2 + $0x2a0] sm:$0xff] }
  0x31   :  { %253 = vmatpush.msrb.mxu1 %v128_v20  ;;  %v126_v28 = vld [vmem:[%s1815_s1 + $0x2b0] sm:$0xff]  ;;  %437 = vmatpush.msrb.mxu3 %v414_v22  ;;  %v108_v35 = vld [vmem:[%s1815_s1 + $0x220] sm:$0xff]  ;;  %v107_v38 = vld [vmem:[%s1815_s1 + $0x218] sm:$0xff] }
  0x32   :  { %234 = vmatpush.msrb.mxu0 %v111_v23  ;;  %v415_v29 = vld [vmem:[%s1816_s2 + $0x350] sm:$0xff]  ;;  %817 = vmatmul.msk.f32.vlgmr.msrb.gmra.mxu2 %vm142_vm0, %v39_v25  ;;  %v124_v36 = vld [vmem:[%s1815_s1 + $0x2a0] sm:$0xff]  ;;  %v123_v39 = vld [vmem:[%s1815_s1 + $0x298] sm:$0xff] }
  0x33   :  { %254 = vmatpush.msrb.mxu1 %v127_v24  ;;  %438 = vmatpush.msrb.mxu3 %v407_v26  ;;  %v401_v37 = vld [vmem:[%s1816_s2 + $0x2e0] sm:$0xff]  ;;  %v394_v40 = vld [vmem:[%s1816_s2 + $0x2a8] sm:$0xff]  ;;  %v106_v41 = vld [vmem:[%s1815_s1 + $0x210] sm:$0xff] }
  0x34   :  { %235 = vmatpush.msrb.mxu0 %v110_v27  ;;  %457 = vmatpush.msra.mxu2 %v415_v29  ;;  %v122_v42 = vld [vmem:[%s1815_s1 + $0x290] sm:$0xff]  ;;  %v105_v43 = vld [vmem:[%s1815_s1 + $0x208] sm:$0xff]  ;;  %v104_v45 = vld [vmem:[%s1815_s1 + $0x200] sm:$0xff] }
  0x35   :  { %255 = vmatpush.msrb.mxu1 %v126_v28  ;;  %439 = vmatpush.msrb.mxu3 %v400_v30  ;;  %v121_v44 = vld [vmem:[%s1815_s1 + $0x288] sm:$0xff]  ;;  %v120_v46 = vld [vmem:[%s1815_s1 + $0x280] sm:$0xff]  ;;  %v416_v49 = vld [vmem:[%s1816_s2 + $0x358] sm:$0xff] }
  0x36   :  { %236 = vmatpush.msrb.mxu0 %v109_v31  ;;  %458 = vmatpush.msra.mxu2 %v408_v33  ;;  %v37_v47 = vld [vmem:[%s1814_s0 + $0x20] sm:$0xff]  ;;  %v38_v48 = vld [vmem:[%s1814_s0 + $0x28] sm:$0xff]  ;;  %v395_v52 = vld [vmem:[%s1816_s2 + $0x2b0] sm:$0xff]  ;;  %s783_s0 = sshll.u32 %s1823_s9, 4  ;;  %s979_s9 = smov [#allocation7]   ;;  %s784_s0 = int_to_ptr.hbm [resolvable:$true] %s783_s0 }
  0x37   :  { %256 = vmatpush.msrb.mxu1 %v125_v32  ;;  %440 = vmatpush.msrb.mxu3 %v393_v34  ;;  %v409_v50 = vld [vmem:[%s1816_s2 + $0x320] sm:$0xff]  ;;  %v402_v51 = vld [vmem:[%s1816_s2 + $0x2e8] sm:$0xff]  ;;  %v387_v54 = vld [vmem:[%s1816_s2 + $0x270] sm:$0xff]  ;;  %s792_s26 = sshll.u32 %s979_s9, 4  ;;  %s793_s26 = int_to_ptr.vmem [resolvable:$true] %s792_s26 }
  0x38   :  { %237 = vmatpush.msrb.mxu0 %v108_v35  ;;  %459 = vmatpush.msra.mxu2 %v401_v37  ;;  %v386_v53 = vld [vmem:[%s1816_s2 + $0x268] sm:$0xff]  ;;  %v388_v55 = vld [vmem:[%s1816_s2 + $0x278] sm:$0xff]  ;;  %v379_v56 = vld [vmem:[%s1816_s2 + $0x230] sm:$0xff] }
  0x39   :  { %257 = vmatpush.msrb.mxu1 %v124_v36  ;;  %441 = vmatpush.msrb.mxu3 %v386_v53  ;;  %v380_v57 = vld [vmem:[%s1816_s2 + $0x238] sm:$0xff]  ;;  %v381_v58 = vld [vmem:[%s1816_s2 + $0x240] sm:$0xff]  ;;  %v374_v61 = vld [vmem:[%s1816_s2 + $0x208] sm:$0xff] }
  0x3a   :  { %238 = vmatpush.msrb.mxu0 %v107_v38  ;;  %460 = vmatpush.msra.mxu2 %v394_v40  ;;  %v372_v59 = vld [vmem:[%s1816_s2 + $0x1f8] sm:$0xff]  ;;  %v373_v60 = vld [vmem:[%s1816_s2 + $0x200] sm:$0xff]  ;;  %v366_v63 = vld [vmem:[%s1816_s2 + $0x1c8] sm:$0xff] }
  0x3b   :  { %258 = vmatpush.msrb.mxu1 %v123_v39  ;;  %442 = vmatpush.msrb.mxu3 %v379_v56  ;;  %v365_v62 = vld [vmem:[%s1816_s2 + $0x1c0] sm:$0xff]  ;;  %v367_v0 = vld [vmem:[%s1816_s2 + $0x1d0] sm:$0xff]  ;;  %v358_v1 = vld [vmem:[%s1816_s2 + $0x188] sm:$0xff] }
  0x3c   :  { %239 = vmatpush.msrb.mxu0 %v106_v41  ;;  %461 = vmatpush.msra.mxu2 %v387_v54  ;;  %v359_v2 = vld [vmem:[%s1816_s2 + $0x190] sm:$0xff]  ;;  %v360_v3 = vld [vmem:[%s1816_s2 + $0x198] sm:$0xff]  ;;  %v353_v6 = vld [vmem:[%s1816_s2 + $0x160] sm:$0xff] }
  0x3d   :  { %259 = vmatpush.msrb.mxu1 %v122_v42  ;;  %443 = vmatpush.msrb.mxu3 %v372_v59  ;;  %v351_v4 = vld [vmem:[%s1816_s2 + $0x150] sm:$0xff]  ;;  %v352_v5 = vld [vmem:[%s1816_s2 + $0x158] sm:$0xff]  ;;  %v345_v8 = vld [vmem:[%s1816_s2 + $0x120] sm:$0xff] }
  0x3e   :  { %240 = vmatpush.msrb.mxu0 %v105_v43  ;;  %462 = vmatpush.msra.mxu2 %v380_v57  ;;  %v344_v7 = vld [vmem:[%s1816_s2 + $0x118] sm:$0xff]  ;;  %v346_v9 = vld [vmem:[%s1816_s2 + $0x128] sm:$0xff]  ;;  %v337_v10 = vld [vmem:[%s1816_s2 + $0xe0] sm:$0xff] }
  0x3f   :  { %260 = vmatpush.msrb.mxu1 %v121_v44  ;;  %444 = vmatpush.msrb.mxu3 %v365_v62  ;;  %v338_v11 = vld [vmem:[%s1816_s2 + $0xe8] sm:$0xff]  ;;  %v339_v12 = vld [vmem:[%s1816_s2 + $0xf0] sm:$0xff]  ;;  %v417_v13 = vld [vmem:[%s1816_s2 + $0x360] sm:$0xff] }
  0x40   :  { %241 = vmatpush.msrb.mxu0 %v104_v45  ;;  %463 = vmatpush.msra.mxu2 %v373_v60  ;;  %v330_v14 = vld [vmem:[%s1816_s2 + $0xa8] sm:$0xff]  ;;  %v331_v15 = vld [vmem:[%s1816_s2 + $0xb0] sm:$0xff]  ;;  %v332_v16 = vld [vmem:[%s1816_s2 + $0xb8] sm:$0xff] }
  0x41   :  { %261 = vmatpush.msrb.mxu1 %v120_v46  ;;  %242 = vmatmul.f32.vlgmr.msrb.gmra.mxu0 %v37_v47  ;;  %v410_v17 = vld [vmem:[%s1816_s2 + $0x328] sm:$0xff]  ;;  %v323_v18 = vld [vmem:[%s1816_s2 + $0x70] sm:$0xff]  ;;  %v324_v19 = vld [vmem:[%s1816_s2 + $0x78] sm:$0xff] }
  0x42   :  { %262 = vmatmul.f32.vlgmr.msrb.gmra.mxu1 %v38_v48  ;;  %477 = vmatpush.msra.mxu0 %v416_v49  ;;  %v325_v20 = vld [vmem:[%s1816_s2 + $0x80] sm:$0xff]  ;;  %v403_v21 = vld [vmem:[%s1816_s2 + $0x2f0] sm:$0xff]  ;;  %v316_v22 = vld [vmem:[%s1816_s2 + $0x38] sm:$0xff] }
  0x43   :  { %464 = vmatpush.msra.mxu2 %v366_v63  ;;  %445 = vmatpush.msrb.mxu3 %v358_v1  ;;  %v317_v23 = vld [vmem:[%s1816_s2 + $0x40] sm:$0xff]  ;;  %v318_v24 = vld [vmem:[%s1816_s2 + $0x48] sm:$0xff]  ;;  %v396_v26 = vld [vmem:[%s1816_s2 + $0x2b8] sm:$0xff] }
  0x44   :  { %478 = vmatpush.msra.mxu0 %v409_v50  ;;  %497 = vmatpush.msra.mxu1 %v417_v13  ;;  %v839_v25 = vld [vmem:[%s1818_s4] ss:$0 sm:$0xff]  ;;  %v310_v28 = vld [vmem:[%s1816_s2 + $0x8] sm:$0xff]  ;;  %v311_v29 = vld [vmem:[%s1816_s2 + $0x10] sm:$0xff] }
  0x45   :  { %465 = vmatpush.msra.mxu2 %v359_v2  ;;  %446 = vmatpush.msrb.mxu3 %v351_v4  ;;  %v309_v27 = vld [vmem:[%s1816_s2] sm:$0xff]  ;;  %v418_v32 = vld [vmem:[%s1816_s2 + $0x368] sm:$0xff]  ;;  %v419_v33 = vld [vmem:[%s1816_s2 + $0x370] sm:$0xff] }
  0x46   :  { %479 = vmatpush.msra.mxu0 %v402_v51  ;;  %498 = vmatpush.msra.mxu1 %v410_v17  ;;  %v389_v31 = vld [vmem:[%s1816_s2 + $0x280] sm:$0xff]  ;;  %v420_v34 = vld [vmem:[%s1816_s2 + $0x378] sm:$0xff]  ;;  %v382_v35 = vld [vmem:[%s1816_s2 + $0x248] sm:$0xff] }
  0x47   :  { %466 = vmatpush.msra.mxu2 %v352_v5  ;;  %447 = vmatpush.msrb.mxu3 %v344_v7  ;;  %v411_v36 = vld [vmem:[%s1816_s2 + $0x330] sm:$0xff]  ;;  %v412_v37 = vld [vmem:[%s1816_s2 + $0x338] sm:$0xff]  ;;  %v413_v39 = vld [vmem:[%s1816_s2 + $0x340] sm:$0xff] }
  0x48   :  { %480 = vmatpush.msra.mxu0 %v395_v52  ;;  %499 = vmatpush.msra.mxu1 %v403_v21  ;;  %v375_v41 = vld [vmem:[%s1816_s2 + $0x210] sm:$0xff]  ;;  %v404_v42 = vld [vmem:[%s1816_s2 + $0x2f8] sm:$0xff]  ;;  %v405_v43 = vld [vmem:[%s1816_s2 + $0x300] sm:$0xff] }
  0x49   :  { %467 = vmatpush.msra.mxu2 %v345_v8  ;;  %448 = vmatpush.msrb.mxu3 %v337_v10  ;;  %v406_v44 = vld [vmem:[%s1816_s2 + $0x308] sm:$0xff]  ;;  %v368_v45 = vld [vmem:[%s1816_s2 + $0x1d8] sm:$0xff]  ;;  %v397_v46 = vld [vmem:[%s1816_s2 + $0x2c0] sm:$0xff] }
  0x4a   :  { %481 = vmatpush.msra.mxu0 %v388_v55  ;;  %500 = vmatpush.msra.mxu1 %v396_v26  ;;  %v398_v47 = vld [vmem:[%s1816_s2 + $0x2c8] sm:$0xff]  ;;  %v399_v49 = vld [vmem:[%s1816_s2 + $0x2d0] sm:$0xff]  ;;  %v361_v51 = vld [vmem:[%s1816_s2 + $0x1a0] sm:$0xff] }
  0x4b   :  { %468 = vmatpush.msra.mxu2 %v338_v11  ;;  %449 = vmatpush.msrb.mxu3 %v330_v14  ;;  %v390_v52 = vld [vmem:[%s1816_s2 + $0x288] sm:$0xff]  ;;  %v391_v53 = vld [vmem:[%s1816_s2 + $0x290] sm:$0xff]  ;;  %v392_v54 = vld [vmem:[%s1816_s2 + $0x298] sm:$0xff] }
  0x4c   :  { %482 = vmatpush.msra.mxu0 %v381_v58  ;;  %501 = vmatpush.msra.mxu1 %v389_v31  ;;  %v354_v55 = vld [vmem:[%s1816_s2 + $0x168] sm:$0xff]  ;;  %v383_v56 = vld [vmem:[%s1816_s2 + $0x250] sm:$0xff]  ;;  %v384_v57 = vld [vmem:[%s1816_s2 + $0x258] sm:$0xff] }
  0x4d   :  { %469 = vmatpush.msra.mxu2 %v331_v15  ;;  %450 = vmatpush.msrb.mxu3 %v323_v18  ;;  %v385_v59 = vld [vmem:[%s1816_s2 + $0x260] sm:$0xff]  ;;  %v376_v62 = vld [vmem:[%s1816_s2 + $0x218] sm:$0xff]  ;;  %v371_v5 = vld [vmem:[%s1816_s2 + $0x1f0] sm:$0xff] }
  0x4e   :  { %483 = vmatpush.msra.mxu0 %v374_v61  ;;  %502 = vmatpush.msra.mxu1 %v382_v35  ;;  %v347_v61 = vld [vmem:[%s1816_s2 + $0x130] sm:$0xff]  ;;  %v377_v63 = vld [vmem:[%s1816_s2 + $0x220] sm:$0xff]  ;;  %v340_v1 = vld [vmem:[%s1816_s2 + $0xf8] sm:$0xff] }
  0x4f   :  { %470 = vmatpush.msra.mxu2 %v324_v19  ;;  %451 = vmatpush.msrb.mxu3 %v316_v22  ;;  %v369_v2 = vld [vmem:[%s1816_s2 + $0x1e0] sm:$0xff]  ;;  %v362_v7 = vld [vmem:[%s1816_s2 + $0x1a8] sm:$0xff]  ;;  %v363_v8 = vld [vmem:[%s1816_s2 + $0x1b0] sm:$0xff] }
  0x50   :  { %484 = vmatpush.msra.mxu0 %v367_v0  ;;  %503 = vmatpush.msra.mxu1 %v375_v41  ;;  %v378_v0 = vld [vmem:[%s1816_s2 + $0x228] sm:$0xff]  ;;  %v355_v13 = vld [vmem:[%s1816_s2 + $0x170] sm:$0xff]  ;;  %v356_v14 = vld [vmem:[%s1816_s2 + $0x178] sm:$0xff] }
  0x51   :  { %471 = vmatpush.msra.mxu2 %v317_v23  ;;  %452 = vmatpush.msrb.mxu3 %v309_v27  ;;  %v319_v17 = vld [vmem:[%s1816_s2 + $0x50] sm:$0xff]  ;;  %v348_v18 = vld [vmem:[%s1816_s2 + $0x138] sm:$0xff]  ;;  %v350_v21 = vld [vmem:[%s1816_s2 + $0x148] sm:$0xff] }
  0x52   :  { %485 = vmatpush.msra.mxu0 %v360_v3  ;;  %504 = vmatpush.msra.mxu1 %v368_v45  ;;  %v370_v3 = vld [vmem:[%s1816_s2 + $0x1e8] sm:$0xff]  ;;  %v312_v22 = vld [vmem:[%s1816_s2 + $0x18] sm:$0xff]  ;;  %v343_v26 = vld [vmem:[%s1816_s2 + $0x110] sm:$0xff] }
  0x53   :  { %472 = vmatpush.msra.mxu2 %v310_v28  ;;  %517 = vmatpush.msra.mxu3 %v418_v32  ;;  %v336_v31 = vld [vmem:[%s1816_s2 + $0xd8] sm:$0xff]  ;;  %v327_v32 = vld [vmem:[%s1816_s2 + $0x90] sm:$0xff] }
  0x54   :  { %486 = vmatpush.msra.mxu0 %v353_v6  ;;  %505 = vmatpush.msra.mxu1 %v361_v51  ;;  %v333_v6 = vld [vmem:[%s1816_s2 + $0xc0] sm:$0xff]  ;;  %v320_v35 = vld [vmem:[%s1816_s2 + $0x58] sm:$0xff] }
  0x55   :  { %537 = vmatpush.msrb.mxu2 %v419_v33  ;;  %518 = vmatpush.msra.mxu3 %v411_v36  ;;  %v328_v33 = vld [vmem:[%s1816_s2 + $0x98] sm:$0xff]  ;;  %v321_v36 = vld [vmem:[%s1816_s2 + $0x60] sm:$0xff] }
  0x56   :  { %487 = vmatpush.msra.mxu0 %v346_v9  ;;  %506 = vmatpush.msra.mxu1 %v354_v55  ;;  %v364_v9 = vld [vmem:[%s1816_s2 + $0x1b8] sm:$0xff]  ;;  %v305_v51 = vld [vmem:[%s1819_s5] sm:$0xff]  ;;  %v974_v55 = vmov 1.0  }
  0x57   :  { %538 = vmatpush.msrb.mxu2 %v412_v37  ;;  %519 = vmatpush.msra.mxu3 %v404_v42  ;;  %v322_v37 = vld [vmem:[%s1816_s2 + $0x68] sm:$0xff] }
  0x58   :  { %488 = vmatpush.msra.mxu0 %v339_v12  ;;  %507 = vmatpush.msra.mxu1 %v347_v61  ;;  %v326_v12 = vld [vmem:[%s1816_s2 + $0x88] sm:$0xff] }
  0x59   :  { %539 = vmatpush.msrb.mxu2 %v405_v43  ;;  %520 = vmatpush.msra.mxu3 %v397_v46 }
  0x5a   :  { %489 = vmatpush.msra.mxu0 %v332_v16  ;;  %508 = vmatpush.msra.mxu1 %v340_v1  ;;  %v357_v16 = vld [vmem:[%s1816_s2 + $0x180] sm:$0xff] }
  0x5b   :  { %540 = vmatpush.msrb.mxu2 %v398_v47  ;;  %521 = vmatpush.msra.mxu3 %v390_v52 }
  0x5c   :  { %490 = vmatpush.msra.mxu0 %v325_v20  ;;  %509 = vmatpush.msra.mxu1 %v333_v6  ;;  %v349_v20 = vld [vmem:[%s1816_s2 + $0x140] sm:$0xff] }
  0x5d   :  { %541 = vmatpush.msrb.mxu2 %v391_v53  ;;  %522 = vmatpush.msra.mxu3 %v383_v56  ;;  %v975_v56 = vmov 0.0  }
  0x5e   :  { %491 = vmatpush.msra.mxu0 %v318_v24  ;;  %510 = vmatpush.msra.mxu1 %v326_v12  ;;  %v341_v24 = vld [vmem:[%s1816_s2 + $0x100] sm:$0xff] }
  0x5f   :  { %542 = vmatpush.msrb.mxu2 %v384_v57  ;;  %523 = vmatpush.msra.mxu3 %v376_v62 }
  0x60   :  { %492 = vmatpush.msra.mxu0 %v311_v29  ;;  %511 = vmatpush.msra.mxu1 %v319_v17  ;;  %v334_v29 = vld [vmem:[%s1816_s2 + $0xc8] sm:$0xff] }
  0x61   :  { %543 = vmatpush.msrb.mxu2 %v377_v63  ;;  %524 = vmatpush.msra.mxu3 %v369_v2 }
  0x62   :  { %557 = vmatpush.msrb.mxu0 %v420_v34  ;;  %512 = vmatpush.msra.mxu1 %v312_v22  ;;  %v329_v34 = vld [vmem:[%s1816_s2 + $0xa0] sm:$0xff] }
  0x63   :  { %544 = vmatpush.msrb.mxu2 %v370_v3  ;;  %525 = vmatpush.msra.mxu3 %v362_v7 }
  0x64   :  { %558 = vmatpush.msrb.mxu0 %v413_v39  ;;  %v314_v39 = vld [vmem:[%s1816_s2 + $0x28] sm:$0xff] }
  0x65   :  { %545 = vmatpush.msrb.mxu2 %v363_v8  ;;  %526 = vmatpush.msra.mxu3 %v355_v13 }
  0x66   :  { %559 = vmatpush.msrb.mxu0 %v406_v44 }
  0x67   :  { %546 = vmatpush.msrb.mxu2 %v356_v14  ;;  %527 = vmatpush.msra.mxu3 %v348_v18 }
  0x68   :  { %560 = vmatpush.msrb.mxu0 %v399_v49 }
  0x69   :  { %547 = vmatpush.msrb.mxu2 %v349_v20  ;;  %528 = vmatpush.msra.mxu3 %v341_v24 }
  0x6a   :  { %561 = vmatpush.msrb.mxu0 %v392_v54 }
  0x6b   :  { %529 = vmatpush.msra.mxu3 %v334_v29 }
  0x6c   :  { %562 = vmatpush.msrb.mxu0 %v385_v59 }
  0x6d   :  { %530 = vmatpush.msra.mxu3 %v327_v32 }
  0x6e   :  { %563 = vmatpush.msrb.mxu0 %v378_v0 }
  0x6f   :  { %531 = vmatpush.msra.mxu3 %v320_v35 }
  0x70   :  { %564 = vmatpush.msrb.mxu0 %v371_v5 }
  0x72   :  { %565 = vmatpush.msrb.mxu0 %v364_v9 }
  0x74   :  { %566 = vmatpush.msrb.mxu0 %v357_v16 }
  0x76   :  { %567 = vmatpush.msrb.mxu0 %v350_v21 }
  0x78   :  { %568 = vmatpush.msrb.mxu0 %v343_v26 }
  0x7a   :  { %569 = vmatpush.msrb.mxu0 %v336_v31 }
  0x7c   :  { %570 = vmatpush.msrb.mxu0 %v329_v34 }
  0x7e   :  { %571 = vmatpush.msrb.mxu0 %v322_v37 }
  0xaa   :  { %v163_v30 = vpop.f32.mrf.mxu0 }
  0xab   :  { %v164_v38 = vadd.f32 %v839_v25, %v163_v30  ;;  %v342_v25 = vld [vmem:[%s1816_s2 + $0x108] sm:$0xff]  ;;  %v335_v30 = vld [vmem:[%s1816_s2 + $0xd0] sm:$0xff] }
  0xac   :  { %548 = vmatpush.msrb.mxu2 %v342_v25 }
  0xad   :  { %v183_v40 = vpop.f32.mrf.mxu1  ;;  %v203_v50 = vpop.f32.mrf.mxu2 }
  0xae   :  { %v184_v48 = vadd.f32 %v183_v40, %v164_v38  ;;  %549 = vmatpush.msrb.mxu2 %v335_v30  ;;  %v313_v38 = vld [vmem:[%s1816_s2 + $0x20] sm:$0xff]  ;;  %v315_v40 = vld [vmem:[%s1816_s2 + $0x30] sm:$0xff] }
  0xaf   :  { %532 = vmatpush.msra.mxu3 %v313_v38  ;;  %572 = vmatpush.msrb.mxu0 %v315_v40 }
  0xb0   :  { %v204_v58 = vadd.f32 %v203_v50, %v184_v48  ;;  %550 = vmatpush.msrb.mxu2 %v328_v33 }
  0xb1   :  { %v223_v60 = vpop.f32.mrf.mxu3 }
  0xb2   :  { %v224_v4 = vadd.f32 %v223_v60, %v204_v58  ;;  %551 = vmatpush.msrb.mxu2 %v321_v36  ;;  %v421_v58 = vld [vmem:[%s1817_s3] sm:$0x7f] }
  0xb3   :  { %v425_v59 = vperm.slane %v421_v58, 2  ;;  %v426_v60 = vperm.slane %v421_v58, 3  ;;  %v423_v1 = vperm.slane %v421_v58, 0  ;;  %v424_v2 = vperm.slane %v421_v58, 1 }
  0xb4   :  { %552 = vmatpush.msrb.mxu2 %v314_v39  ;;  %v429_v7 = vperm.slane %v421_v58, 6  ;;  %v427_v18 = vperm.slane %v421_v58, 4 }
  0xb5   :  { %v283_v19 = vpop.f32.mrf.mxu2 }
  0xbe   :  { %v243_v10 = vpop.f32.mrf.mxu0 }
  0xbf   :  { %v263_v11 = vpop.f32.mrf.mxu1  ;;  %v244_v15 = vadd.f32 %v243_v10, %v224_v4 }
  0xc1   :  { %v264_v23 = vadd.f32 %v263_v11, %v244_v15 }
  0xc3   :  { %v284_v27 = vadd.f32 %v283_v19, %v264_v23  ;;  %v428_v19 = vperm.slane %v421_v58, 5 }
  0xc5   :  { %v818_v28 = vmul.f32 -1.442695, %v284_v27 }
  0xc7   :  { %840 = vpow2.f32 %v818_v28 }
  0xcd   :  { %v841_v41 = vpop.eup %840 }
  0xce   :  { %v289_v42 = vadd.f32 1.0, %v841_v41 }
  0xd0   :  { %842 = vrcp.f32 %v289_v42  ;;  %v301_v46 = vand.u32 2147483648, %v289_v42  ;;  %v299_v48 = vand.u32 2147483647, %v289_v42  ;;  %vm295_vm2 = vweird.f32 %v289_v42 }
  0xd2   :  { %v302_v50 = vor.u32 1.1754944e-38, %v301_v46  ;;  %vm300_vm4 = vcmp.eq.f32.partialorder %v299_v48, 8.507059e+37 }
  0xd6   :  { %v843_v43 = vpop.eup %842 }
  0xd7   :  { %v291_v44 = vmul.f32 %v843_v43, %v289_v42  ;;  %vm296_vm1 = vweird.f32 %v843_v43 }
  0xd8   :  { %vm297_vm3 = vmor %vm295_vm2, %vm296_vm1 }
  0xd9   :  { %v292_v45 = vsub.f32 1.0, %v291_v44 }
  0xdb   :  { %v293_v47 = vmul.f32 %v843_v43, %v292_v45 }
  0xdd   :  { %v294_v49 = vadd.f32 %v843_v43, %v293_v47 }
  0xdf   :  { %v298_v52 = vsel %vm297_vm3, %v843_v43, %v294_v49 }
  0xe0   :  { %v303_v53 = vsel %vm300_vm4, %v302_v50, %v298_v52 }
  0xe1   :  { %v306_v54 = vsub.f32 %v303_v53, %v305_v51  ;;  %738 = vst [vmem:[#allocation2] sm:$0xff] %v303_v53 }
  0xe2   :  { %764 = dma.vmem_to_hbm [thread:$0]  %s760_s29, 128, %s762_s12, [#allocation3]  }
  0xe3   :  { %vm307_vm5 = vcmp.gt.f32.partialorder %v306_v54, 0.0  ;;  %s794_s29 = sshll.u32 %s1824_s10, 4  ;;  %s795_s29 = int_to_ptr.hbm [resolvable:$true] %s794_s29 }
  0xe4   :  { %819 = vmatmul.msk.f32.vlgmr.msrb.gmra.mxu3 %vm307_vm5, %v974_v55  ;;  %820 = vmatmul.msk.f32.vlgmr.msra.gmra.mxu2 %vm307_vm5, %v974_v55  ;;  %v308_v57 = vsel %vm307_vm5, 1.0, %v975_v56 }
  0xe5   :  { %821 = vmatmul.msk.f32.vlgmr.msra.gmra.mxu0 %vm307_vm5, %v974_v55  ;;  %822 = vmatmul.msk.f32.vlgmr.msra.gmra.mxu1 %vm307_vm5, %v974_v55  ;;  %739 = vst [vmem:[#allocation4] sm:$0xff] %v308_v57 }
  0xe6   :  { %775 = dma.vmem_to_hbm [thread:$0]  %s771_s27, 128, %s773_s25, [#allocation5]  }
  0xec   :  { %823 = vmatmul.msk.f32.vlgmr.msra.gmra.mxu3 %vm307_vm5, %v974_v55  ;;  %824 = vmatmul.msk.f32.vlgmr.msrb.gmra.mxu2 %vm307_vm5, %v974_v55 }
  0xed   :  { %825 = vmatmul.msk.f32.vlgmr.msrb.gmra.mxu0 %vm307_vm5, %v974_v55 }
 0x162   :  { %v494_v61 = vpop.f32.mrf.mxu0  ;;  %v514_v62 = vpop.f32.mrf.mxu1 }
 0x163   :  { %v495_v63 = vadd.f32 %v494_v61, %v425_v59  ;;  %v515_v0 = vadd.f32 %v514_v62, %v426_v60  ;;  %v712_v59 = vld [vmem:[%s1820_s6 + $0x10] sm:$0xff] }
 0x165   :  { %v828_v3 = vmul.f32 -1.442695, %v495_v63  ;;  %v829_v4 = vmul.f32 -1.442695, %v515_v0 }
 0x167   :  { %844 = vpow2.f32 %v828_v3  ;;  %v454_v5 = vpop.f32.mrf.mxu3  ;;  %v474_v6 = vpop.f32.mrf.mxu2 }
 0x168   :  { %846 = vpow2.f32 %v829_v4  ;;  %v455_v8 = vadd.f32 %v454_v5, %v423_v1  ;;  %v475_v9 = vadd.f32 %v474_v6, %v424_v2  ;;  %v713_v2 = vld [vmem:[%s1820_s6 + $0x18] sm:$0xff] }
 0x16a   :  { %v826_v10 = vmul.f32 -1.442695, %v455_v8  ;;  %v827_v11 = vmul.f32 -1.442695, %v475_v9  ;;  %v574_v12 = vpop.f32.mrf.mxu0 }
 0x16b   :  { %v575_v13 = vadd.f32 %v574_v12, %v429_v7 }
 0x16c   :  { %848 = vpow2.f32 %v826_v10 }
 0x16d   :  { %v845_v14 = vpop.eup %844  ;;  %850 = vpow2.f32 %v827_v11  ;;  %v832_v15 = vmul.f32 -1.442695, %v575_v13 }
 0x16e   :  { %v847_v16 = vpop.eup %846  ;;  %v600_v17 = vadd.f32 1.0, %v845_v14 }
 0x16f   :  { %v601_v20 = vadd.f32 1.0, %v847_v16  ;;  %852 = vpow2.f32 %v832_v15  ;;  %v534_v21 = vpop.f32.mrf.mxu3  ;;  %v554_v22 = vpop.f32.mrf.mxu2 }
 0x170   :  { %854 = vrcp.f32 %v600_v17  ;;  %v535_v24 = vadd.f32 %v534_v21, %v427_v18  ;;  %v555_v25 = vadd.f32 %v554_v22, %v428_v19  ;;  %v644_v28 = vand.u32 2147483647, %v600_v17  ;;  %v710_v18 = vld [vmem:[%s1820_s6] sm:$0xff] }
 0x171   :  { %856 = vrcp.f32 %v601_v20  ;;  %v646_v29 = vand.u32 2147483648, %v600_v17  ;;  %v659_v30 = vand.u32 2147483647, %v601_v20  ;;  %v661_v33 = vand.u32 2147483648, %v601_v20 }
 0x172   :  { %v849_v23 = vpop.eup %848  ;;  %v830_v34 = vmul.f32 -1.442695, %v535_v24  ;;  %v831_v36 = vmul.f32 -1.442695, %v555_v25  ;;  %vm640_vm6 = vweird.f32 %v600_v17  ;;  %vm655_vm7 = vweird.f32 %v601_v20 }
 0x173   :  { %v851_v26 = vpop.eup %850  ;;  %v1703_v27 = vadd.f32 1.0, %v849_v23  ;;  %vm1709_vm8 = vcmp.eq.f32.partialorder %v644_v28, 8.507059e+37  ;;  %v647_v40 = vor.u32 1.1754944e-38, %v646_v29  ;;  %vm1713_vm9 = vcmp.eq.f32.partialorder %v659_v30, 8.507059e+37  ;;  %v711_v23 = vld [vmem:[%s1820_s6 + $0x8] sm:$0xff] }
 0x174   :  { %v1705_v31 = vadd.f32 1.0, %v851_v26  ;;  %v662_v44 = vor.u32 1.1754944e-38, %v661_v33 }
 0x175   :  { %v853_v32 = vpop.eup %852  ;;  %858 = vrcp.f32 %v1703_v27  ;;  %v614_v47 = vand.u32 2147483647, %v1703_v27  ;;  %v616_v48 = vand.u32 2147483648, %v1703_v27  ;;  %vm610_vm11 = vweird.f32 %v1703_v27 }
 0x176   :  { %v855_v35 = vpop.eup %854  ;;  %860 = vrcp.f32 %v1705_v31  ;;  %v1717_v45 = vadd.f32 1.0, %v853_v32  ;;  %vm625_vm13 = vweird.f32 %v1705_v31  ;;  %v629_v57 = vand.u32 2147483647, %v1705_v31 }
 0x177   :  { %v857_v37 = vpop.eup %856  ;;  %v636_v38 = vmul.f32 %v855_v35, %v600_v17  ;;  %862 = vpow2.f32 %v830_v34  ;;  %vm641_vm10 = vweird.f32 %v855_v35  ;;  %v631_v58 = vand.u32 2147483648, %v1705_v31 }
 0x178   :  { %v651_v41 = vmul.f32 %v857_v37, %v601_v20  ;;  %864 = vpow2.f32 %v831_v36  ;;  %vm656_vm12 = vweird.f32 %v857_v37  ;;  %vm642_vm14 = vmor %vm640_vm6, %vm641_vm10  ;;  %vm1732_vm15 = vcmp.eq.f32.partialorder %v614_v47, 8.507059e+37 }
 0x179   :  { %v637_v43 = vsub.f32 1.0, %v636_v38  ;;  %866 = vrcp.f32 %v1717_v45  ;;  %v617_v63 = vor.u32 1.1754944e-38, %v616_v48  ;;  %vm657_vm1 = vmor %vm655_vm7, %vm656_vm12  ;;  %vm1749_vm4 = vcmp.eq.f32.partialorder %v629_v57, 8.507059e+37 }
 0x17a   :  { %v652_v46 = vsub.f32 1.0, %v651_v41  ;;  %v632_v20 = vor.u32 1.1754944e-38, %v631_v58  ;;  %v704_v21 = vand.u32 2147483647, %v1717_v45  ;;  %v706_v25 = vand.u32 2147483648, %v1717_v45 }
 0x17b   :  { %v859_v49 = vpop.eup %858  ;;  %v638_v50 = vmul.f32 %v855_v35, %v637_v43 }
 0x17c   :  { %v861_v51 = vpop.eup %860  ;;  %v653_v52 = vmul.f32 %v857_v37, %v652_v46  ;;  %v606_v53 = vmul.f32 %v859_v49, %v1703_v27  ;;  %vm611_vm2 = vweird.f32 %v859_v49  ;;  %v707_v36 = vor.u32 1.1754944e-38, %v706_v25 }
 0x17d   :  { %v639_v54 = vadd.f32 %v855_v35, %v638_v50  ;;  %v621_v55 = vmul.f32 %v861_v51, %v1705_v31  ;;  %v863_v0 = vpop.eup %862  ;;  %vm626_vm3 = vweird.f32 %v861_v51  ;;  %vm612_vm5 = vmor %vm610_vm11, %vm611_vm2  ;;  %vm700_vm11 = vweird.f32 %v1717_v45 }
 0x17e   :  { %v654_v60 = vadd.f32 %v857_v37, %v653_v52  ;;  %v607_v61 = vsub.f32 1.0, %v606_v53  ;;  %v865_v4 = vpop.eup %864  ;;  %v1743_v8 = vadd.f32 1.0, %v863_v0  ;;  %vm627_vm6 = vmor %vm625_vm13, %vm626_vm3  ;;  %v715_v0 = vld [vmem:[%s1820_s6 + $0x28] sm:$0xff] }
 0x17f   :  { %v643_v1 = vsel %vm642_vm14, %v855_v35, %v639_v54  ;;  %v622_v3 = vsub.f32 1.0, %v621_v55  ;;  %v867_v9 = vpop.eup %866  ;;  %v1747_v13 = vadd.f32 1.0, %v865_v4  ;;  %vm705_vm14 = vcmp.eq.f32.partialorder %v704_v21, 8.507059e+37 }
 0x180   :  { %v648_v5 = vsel %vm1709_vm8, %v647_v40, %v643_v1  ;;  %v658_v6 = vsel %vm657_vm1, %v857_v37, %v654_v60  ;;  %v608_v7 = vmul.f32 %v859_v49, %v607_v61  ;;  %v696_v17 = vmul.f32 %v867_v9, %v1717_v45  ;;  %v716_v37 = vld [vmem:[%s1820_s6 + $0x30] sm:$0xff] }
 0x181   :  { %v719_v10 = vsub.f32 %v648_v5, %v712_v59  ;;  %742 = vst [vmem:[#allocation6 + $0x10] sm:$0xff] %v648_v5  ;;  %v663_v11 = vsel %vm1713_vm9, %v662_v44, %v658_v6  ;;  %v623_v12 = vmul.f32 %v861_v51, %v622_v3  ;;  %868 = vrcp.f32 %v1743_v8  ;;  %v714_v59 = vld [vmem:[%s1820_s6 + $0x20] sm:$0xff] }
 0x182   :  { %v720_v14 = vsub.f32 %v663_v11, %v713_v2  ;;  %743 = vst [vmem:[#allocation6 + $0x18] sm:$0xff] %v663_v11  ;;  %v609_v15 = vadd.f32 %v859_v49, %v608_v7  ;;  %v697_v24 = vsub.f32 1.0, %v696_v17  ;;  %vm701_vm7 = vweird.f32 %v867_v9 }
 0x183   :  { %v624_v19 = vadd.f32 %v861_v51, %v623_v12  ;;  %vm726_vm8 = vcmp.gt.f32.partialorder %v719_v10, 0.0  ;;  %870 = vrcp.f32 %v1747_v13  ;;  %vm702_vm13 = vmor %vm700_vm11, %vm701_vm7  ;;  %v674_v48 = vand.u32 2147483647, %v1743_v8 }
 0x184   :  { %v613_v22 = vsel %vm612_vm5, %v859_v49, %v609_v15  ;;  %vm1772_vm9 = vcmp.gt.f32.partialorder %v720_v14, 0.0  ;;  %v698_v31 = vmul.f32 %v867_v9, %v697_v24  ;;  %v733_v34 = vsel %vm726_vm8, 1.0, %v975_v56 }
 0x185   :  { %v618_v26 = vsel %vm1732_vm15, %v617_v63, %v613_v22  ;;  %v628_v27 = vsel %vm627_vm6, %v861_v51, %v624_v19  ;;  %v734_v39 = vsel %vm1772_vm9, 1.0, %v975_v56  ;;  %749 = vst [vmem:[#allocation7 + $0x10] sm:$0xff] %v733_v34  ;;  %v676_v49 = vand.u32 2147483648, %v1743_v8 }
 0x186   :  { %v717_v29 = vsub.f32 %v618_v26, %v710_v18  ;;  %740 = vst [vmem:[#allocation6] sm:$0xff] %v618_v26  ;;  %v633_v30 = vsel %vm1749_vm4, %v632_v20, %v628_v27  ;;  %v699_v33 = vadd.f32 %v867_v9, %v698_v31  ;;  %vm670_vm2 = vweird.f32 %v1743_v8 }
 0x187   :  { %v718_v32 = vsub.f32 %v633_v30, %v711_v23  ;;  %741 = vst [vmem:[#allocation6 + $0x8] sm:$0xff] %v633_v30  ;;  %v869_v35 = vpop.eup %868  ;;  %v691_v52 = vand.u32 2147483648, %v1747_v13  ;;  %v689_v57 = vand.u32 2147483647, %v1747_v13  ;;  %v677_v58 = vor.u32 1.1754944e-38, %v676_v49 }
 0x188   :  { %vm724_vm10 = vcmp.gt.f32.partialorder %v717_v29, 0.0  ;;  %v703_v40 = vsel %vm702_vm13, %v867_v9, %v699_v33  ;;  %v666_v41 = vmul.f32 %v869_v35, %v1743_v8  ;;  %750 = vst [vmem:[#allocation7 + $0x18] sm:$0xff] %v734_v39  ;;  %vm671_vm1 = vweird.f32 %v869_v35 }
 0x189   :  { %vm725_vm12 = vcmp.gt.f32.partialorder %v718_v32, 0.0  ;;  %v731_v38 = vsel %vm724_vm10, 1.0, %v975_v56  ;;  %v871_v42 = vpop.eup %870  ;;  %v708_v43 = vsel %vm705_vm14, %v707_v36, %v703_v40  ;;  %vm672_vm4 = vmor %vm670_vm2, %vm671_vm1  ;;  %vm675_vm5 = vcmp.eq.f32.partialorder %v674_v48, 8.507059e+37 }
 0x18a   :  { %747 = vst [vmem:[#allocation7] sm:$0xff] %v731_v38  ;;  %v732_v44 = vsel %vm725_vm12, 1.0, %v975_v56  ;;  %v723_v45 = vsub.f32 %v708_v43, %v716_v37  ;;  %v667_v46 = vsub.f32 1.0, %v666_v41  ;;  %v681_v47 = vmul.f32 %v871_v42, %v1747_v13 }
 0x18b   :  { %746 = vst.msk [vmem:[#allocation6 + $0x30] sm:$0xff] %vm142_vm0, %v708_v43  ;;  %vm686_vm3 = vweird.f32 %v871_v42  ;;  %vm685_vm6 = vweird.f32 %v1747_v13  ;;  %v692_v63 = vor.u32 1.1754944e-38, %v691_v52 }
 0x18c   :  { %748 = vst [vmem:[#allocation7 + $0x8] sm:$0xff] %v732_v44  ;;  %vm730_vm15 = vcmp.gt.f32.partialorder %v723_v45, 0.0  ;;  %v668_v50 = vmul.f32 %v869_v35, %v667_v46  ;;  %v682_v51 = vsub.f32 1.0, %v681_v47  ;;  %vm687_vm7 = vmor %vm685_vm6, %vm686_vm3 }
 0x18d   :  { %v737_v53 = vsel %vm730_vm15, 1.0, %v975_v56 }
 0x18e   :  { %v669_v54 = vadd.f32 %v869_v35, %v668_v50  ;;  %v683_v55 = vmul.f32 %v871_v42, %v682_v51  ;;  %753 = vst.msk [vmem:[#allocation7 + $0x30] sm:$0xff] %vm142_vm0, %v737_v53  ;;  %vm690_vm0 = vcmp.eq.f32.partialorder %v689_v57, 8.507059e+37 }
 0x190   :  { %v673_v60 = vsel %vm672_vm4, %v869_v35, %v669_v54  ;;  %v684_v61 = vadd.f32 %v871_v42, %v683_v55 }
 0x191   :  { %v678_v62 = vsel %vm675_vm5, %v677_v58, %v673_v60 }
 0x192   :  { %v721_v1 = vsub.f32 %v678_v62, %v714_v59  ;;  %744 = vst [vmem:[#allocation6 + $0x20] sm:$0xff] %v678_v62  ;;  %v688_v2 = vsel %vm687_vm7, %v871_v42, %v684_v61 }
 0x193   :  { %v693_v3 = vsel %vm690_vm0, %v692_v63, %v688_v2 }
 0x194   :  { %vm728_vm8 = vcmp.gt.f32.partialorder %v721_v1, 0.0  ;;  %v722_v4 = vsub.f32 %v693_v3, %v715_v0  ;;  %745 = vst [vmem:[#allocation6 + $0x28] sm:$0xff] %v693_v3 }
 0x195   :  { %786 = dma.vmem_to_hbm [thread:$0]  %s782_s23, 896, %s784_s0, [#allocation5]   ;;  %v735_v5 = vsel %vm728_vm8, 1.0, %v975_v56 }
 0x196   :  { %vm729_vm9 = vcmp.gt.f32.partialorder %v722_v4, 0.0  ;;  %751 = vst [vmem:[#allocation7 + $0x20] sm:$0xff] %v735_v5 }
 0x197   :  { %v736_v6 = vsel %vm729_vm9, 1.0, %v975_v56 }
 0x198   :  { %752 = vst [vmem:[#allocation7 + $0x28] sm:$0xff] %v736_v6 }
 0x199   :  { %797 = dma.vmem_to_hbm [thread:$0]  %s793_s26, 896, %s795_s29, [#allocation8]  }
 0x19a   :  { %968 = dma.done.wait [#allocation3], 128  }
 0x19b   :  { %969 = vsyncadd [#allocation3], 4294967168 }
 0x19c   :  { %970 = dma.done.wait [#allocation5], 1024  }
 0x19d   :  { %971 = vsyncadd [#allocation5], 4294966272 }
 0x19e   :  { %972 = dma.done.wait [#allocation8], 896  }
 0x19f   :  { %973 = vsyncadd [#allocation8], 4294966400 }
 0x1a0   :  { %814 = vsyncpa [#allocation3], 1 }
 0x1a1   :  { %815 = vsyncpa [#allocation5], 1 }
 0x1a2   :  { %816 = vsyncpa [#allocation8], 1 }

</bundles_post_ra>
